<compile_context>
chip_gen: v5e
topology: v5e:2x2
jax: 0.10.0
libtpu: 0.0.40
codegen_flags: <defaults>
</compile_context>

<pallas_src>
import functools

import jax
import jax.numpy as jnp
from jax.experimental import pallas as pl
from jax.experimental.pallas import tpu as pltpu


def _bilinear_dot_kernel(x1_ref, x2_ref, w1_ref, b1_ref, w2_ref, b2_ref, o_ref):
    """Fused: two Linear layers + elementwise product + per-row reduction.

    x1_ref : (TB, D1)  fc1 features, producer dtype (f32 or bf16)
    x2_ref : (TB, D2)  fc2 features, producer dtype
    w1_ref : (D1, H)   fc1 weight, pre-transposed, compute dtype (f32 or bf16)
    w2_ref : (D2, H)   fc2 weight, pre-transposed, compute dtype
    b1_ref : (1, H)    fc1 bias (f32)
    b2_ref : (1, H)    fc2 bias (f32)
    o_ref  : (1, TB)   lane-dense row of per-sample dot products (f32)
    """
    cdt = w1_ref.dtype
    # Cast AFTER load (no-op on the f32 path): keeps HBM traffic at the producer dtype
    # and avoids a separate wrapper-side astype pass.
    x1 = x1_ref[...].astype(cdt)
    x2 = x2_ref[...].astype(cdt)
    hx1 = jnp.dot(x1, w1_ref[...], preferred_element_type=jnp.float32) + b1_ref[...]
    hx2 = jnp.dot(x2, w2_ref[...], preferred_element_type=jnp.float32) + b2_ref[...]
    s = jnp.sum(hx1 * hx2, axis=1, keepdims=True)        # (TB, 1) f32, per-row only
    o_ref[...] = s.T.astype(o_ref.dtype)                 # one XLU transpose -> lane-dense store


def prepare_params(w1, b1, w2, b2, *, compute_dtype=jnp.float32):
    """One-time parameter prep (hoisted out of the per-call hot path).

    w1 : (H, 512), w2 : (H, 256)  — PyTorch-layout (spectral-normalized) Linear weights.
    b1, b2 : (H,)                 — Linear biases.
    Returns (w1t, b1r, w2t, b2r): weights lane-dense as (in, out) in `compute_dtype`,
    biases as (1, H) f32 rows.
    """
    w1t = jnp.asarray(w1, jnp.float32).T.astype(compute_dtype)   # (512, H)
    w2t = jnp.asarray(w2, jnp.float32).T.astype(compute_dtype)   # (256, H)
    b1r = jnp.asarray(b1, jnp.float32).reshape(1, -1)            # (1, H)
    b2r = jnp.asarray(b2, jnp.float32).reshape(1, -1)            # (1, H)
    return w1t, b1r, w2t, b2r


def _choose_tile(B, block_b):
    """Pick the batch tile size (static, at trace time)."""
    if block_b is not None:
        if B <= block_b:
            return B                                   # single block: equals full dims
        assert block_b % 128 == 0, "block_b must be a multiple of 128 when tiling"
        return block_b
    if B <= 256:
        return B                                       # single block: equals full dims
    # >= 2 tiles (megacore on v7x), up to 2048 rows per tile, 128-lane aligned so the
    # (1, tb) output block stores unmasked lane-dense rows.
    return min(2048, pl.cdiv(pl.cdiv(B, 2), 128) * 128)


@functools.partial(jax.jit, static_argnames=("block_b",))
def xx_discriminator_dot(x1_feat, x2_feat, params, *, block_b=None):
    """Pallas implementation of XXDiscriminatorDot.forward (post feature extractors).

    x1_feat : (B, 512) — output of the external x1_discrimination net (f32 or bf16).
    x2_feat : (B, 256) — output of the external x2_discrimination net.
    params  : output of prepare_params().
    returns : (B, 1) float32.
    """
    w1t, b1r, w2t, b2r = params
    B = x1_feat.shape[0]
    D1, H = w1t.shape
    D2 = w2t.shape[0]
    assert x1_feat.shape == (B, D1) and x2_feat.shape == (B, D2)

    tb = _choose_tile(B, block_b)
    num_tiles = pl.cdiv(B, tb)   # ragged last block handled by Pallas masking (no pad copy)

    out_row = pl.pallas_call(
        _bilinear_dot_kernel,
        out_shape=jax.ShapeDtypeStruct((1, B), jnp.float32),
        grid=(num_tiles,),
        in_specs=[
            pl.BlockSpec((tb, D1), lambda i: (i, 0)),   # x1 tile: marches with the grid
            pl.BlockSpec((tb, D2), lambda i: (i, 0)),   # x2 tile: marches with the grid
            pl.BlockSpec((D1, H), lambda i: (0, 0)),    # w1t: resident (constant block)
            pl.BlockSpec((1, H), lambda i: (0, 0)),     # b1 : resident
            pl.BlockSpec((D2, H), lambda i: (0, 0)),    # w2t: resident
            pl.BlockSpec((1, H), lambda i: (0, 0)),     # b2 : resident
        ],
        out_specs=pl.BlockSpec((1, tb), lambda i: (0, i)),  # lane-dense output row
        compiler_params=pltpu.CompilerParams(
            dimension_semantics=("parallel",),   # independent batch tiles (megacore)
        ),
    )(x1_feat, x2_feat, w1t, b1r, w2t, b2r)

    return out_row[0, :].reshape(B, 1)


def _spectral_normalize(w, n_iter=20):
    """Mimic nn.utils.spectral_norm at eval: W / sigma_max(W), via power iteration."""
    h, _ = w.shape
    u = jnp.ones((h,), jnp.float32) / jnp.sqrt(h)
    v = None
    for _ in range(n_iter):
        v = w.T @ u
        v = v / (jnp.linalg.norm(v) + 1e-12)
        u = w @ v
        u = u / (jnp.linalg.norm(u) + 1e-12)
    sigma = u @ (w @ v)
    return w / sigma


def _init_linear(key, out_features, in_features):
    """PyTorch nn.Linear default init: U(-1/sqrt(in), 1/sqrt(in)) for weight and bias."""
    kw, kb = jax.random.split(key)
    bound = 1.0 / jnp.sqrt(in_features)
    w = jax.random.uniform(kw, (out_features, in_features), jnp.float32, -bound, bound)
    b = jax.random.uniform(kb, (out_features,), jnp.float32, -bound, bound)
    return w, b


if __name__ == "__main__":
    key = jax.random.PRNGKey(0)
    k1, k2, kx1, kx2, kx3, kx4 = jax.random.split(key, 6)

    D1, D2, H = 512, 256, 256     # fc1: Linear(512, H), fc2: Linear(256, H); hidden_dim=256

    # Deterministic parameter init (spectral_norm=True path), done once.
    w1, b1 = _init_linear(k1, H, D1)
    w2, b2 = _init_linear(k2, H, D2)
    w1 = _spectral_normalize(w1)
    w2 = _spectral_normalize(w2)

    # ---------- test 1: f32 path, small batch (single block) ----------
    B = 8
    x1_feat = jax.random.normal(kx1, (B, D1), jnp.float32)
    x2_feat = jax.random.normal(kx2, (B, D2), jnp.float32)

    params_f32 = prepare_params(w1, b1, w2, b2)                  # glue hoisted: runs once
    out = jax.block_until_ready(xx_discriminator_dot(x1_feat, x2_feat, params_f32))

    ref = jnp.sum((x1_feat @ w1.T + b1) * (x2_feat @ w2.T + b2), axis=1, keepdims=True)
    assert out.shape == (B, 1), out.shape
    assert jnp.allclose(out, ref, atol=2e-3, rtol=2e-3), (out, ref)

    # ---------- test 2: bf16 MXU path, tiled grid with ragged last block (no pad) ----------
    Bt = 300                      # 2 tiles of 256 rows; last block masked (no jnp.pad copy)
    x1_big = jax.random.normal(kx3, (Bt, D1), jnp.float32)
    x2_big = jax.random.normal(kx4, (Bt, D2), jnp.float32)

    params_bf16 = prepare_params(w1, b1, w2, b2, compute_dtype=jnp.bfloat16)
    out_t = jax.block_until_ready(xx_discriminator_dot(x1_big, x2_big, params_bf16))

    # Reference with the same in-kernel bf16 rounding of inputs/weights, f32 accumulate.
    x1r = x1_big.astype(jnp.bfloat16).astype(jnp.float32)
    x2r = x2_big.astype(jnp.bfloat16).astype(jnp.float32)
    w1r = w1.astype(jnp.bfloat16).astype(jnp.float32)
    w2r = w2.astype(jnp.bfloat16).astype(jnp.float32)
    ref_t = jnp.sum((x1r @ w1r.T + b1) * (x2r @ w2r.T + b2), axis=1, keepdims=True)
    assert out_t.shape == (Bt, 1), out_t.shape
    assert jnp.allclose(out_t, ref_t, atol=1e-2, rtol=1e-2), (out_t, ref_t)

    print("KERNEL_OK")
</pallas_src>

<mosaic_0001>
module attributes {stable_mosaic.version = 11 : i64} {
  func.func @_bilinear_dot_kernel(%arg0: i32, %arg1: memref<8x512xf32, #tpu.memory_space<vmem>>, %arg2: memref<8x256xf32, #tpu.memory_space<vmem>>, %arg3: memref<512x256xf32, #tpu.memory_space<vmem>>, %arg4: memref<1x256xf32, #tpu.memory_space<vmem>>, %arg5: memref<256x256xf32, #tpu.memory_space<vmem>>, %arg6: memref<1x256xf32, #tpu.memory_space<vmem>>, %arg7: memref<1x8xf32, #tpu.memory_space<vmem>>) attributes {dimension_semantics = [#tpu.dimension_semantics<parallel>], iteration_bounds = array<i64: 1>, scalar_prefetch = 0 : i64, scratch_operands = 0 : i64, tpu.core_type = #tpu.core_type<tc>, window_params = [{transform_indices = @transform_0, window_bounds = array<i64: 8, 512>}, {transform_indices = @transform_1, window_bounds = array<i64: 8, 256>}, {pipeline_mode = #tpu.pipeline_mode<synchronous>, transform_indices = @transform_2, window_bounds = array<i64: 512, 256>}, {pipeline_mode = #tpu.pipeline_mode<synchronous>, transform_indices = @transform_3, window_bounds = array<i64: 1, 256>}, {pipeline_mode = #tpu.pipeline_mode<synchronous>, transform_indices = @transform_4, window_bounds = array<i64: 256, 256>}, {pipeline_mode = #tpu.pipeline_mode<synchronous>, transform_indices = @transform_5, window_bounds = array<i64: 1, 256>}, {transform_indices = @transform_6, window_bounds = array<i64: 1, 8>}]} {
    %c0 = arith.constant 0 : index
    %c0_0 = arith.constant 0 : index
    %0 = vector.load %arg1[%c0, %c0_0] : memref<8x512xf32, #tpu.memory_space<vmem>>, vector<8x512xf32>
    %c0_1 = arith.constant 0 : index
    %c0_2 = arith.constant 0 : index
    %1 = vector.load %arg2[%c0_1, %c0_2] : memref<8x256xf32, #tpu.memory_space<vmem>>, vector<8x256xf32>
    %c0_3 = arith.constant 0 : index
    %c0_4 = arith.constant 0 : index
    %2 = vector.load %arg3[%c0_3, %c0_4] : memref<512x256xf32, #tpu.memory_space<vmem>>, vector<512x256xf32>
    %cst = arith.constant dense<0.000000e+00> : vector<8x256xf32>
    %3 = tpu.matmul %0, %2, %cst {dimension_numbers = #tpu.dot_dimension_numbers<[1], [0], [0], [1], [0, 0, 1, 1], [], []>} : vector<8x512xf32>, vector<512x256xf32>, vector<8x256xf32> -> vector<8x256xf32>
    %c0_5 = arith.constant 0 : index
    %c0_6 = arith.constant 0 : index
    %4 = vector.load %arg4[%c0_5, %c0_6] : memref<1x256xf32, #tpu.memory_space<vmem>>, vector<1x256xf32>
    %5 = vector.broadcast %4 : vector<1x256xf32> to vector<8x256xf32>
    %6 = arith.addf %3, %5 : vector<8x256xf32>
    %c0_7 = arith.constant 0 : index
    %c0_8 = arith.constant 0 : index
    %7 = vector.load %arg5[%c0_7, %c0_8] : memref<256x256xf32, #tpu.memory_space<vmem>>, vector<256x256xf32>
    %cst_9 = arith.constant dense<0.000000e+00> : vector<8x256xf32>
    %8 = tpu.matmul %1, %7, %cst_9 {dimension_numbers = #tpu.dot_dimension_numbers<[1], [0], [0], [1], [0, 0, 1, 1], [], []>} : vector<8x256xf32>, vector<256x256xf32>, vector<8x256xf32> -> vector<8x256xf32>
    %c0_10 = arith.constant 0 : index
    %c0_11 = arith.constant 0 : index
    %9 = vector.load %arg6[%c0_10, %c0_11] : memref<1x256xf32, #tpu.memory_space<vmem>>, vector<1x256xf32>
    %10 = vector.broadcast %9 : vector<1x256xf32> to vector<8x256xf32>
    %11 = arith.addf %8, %10 : vector<8x256xf32>
    %12 = arith.mulf %6, %11 : vector<8x256xf32>
    %cst_12 = arith.constant dense<0.000000e+00> : vector<8xf32>
    %13 = vector.multi_reduction <add>, %12, %cst_12 [1] : vector<8x256xf32> to vector<8xf32>
    %14 = vector.shape_cast %13 : vector<8xf32> to vector<8x1xf32>
    %15 = tpu.transpose %14, [1, 0] : vector<8x1xf32> -> vector<1x8xf32>
    %c0_13 = arith.constant 0 : index
    %c0_14 = arith.constant 0 : index
    %16 = vector.load %arg7[%c0_13, %c0_14] : memref<1x8xf32, #tpu.memory_space<vmem>>, vector<1x8xf32>
    tpu.vector_store %arg7[%c0_13, %c0_14], %15 {strides = array<i32>} : memref<1x8xf32, #tpu.memory_space<vmem>>, vector<1x8xf32>,
    return
  }
  func.func @transform_0(%arg0: i32) -> (i32, i32) {
    %c0_i32 = arith.constant 0 : i32
    %c0_i32_0 = arith.constant 0 : i32
    return %arg0, %c0_i32 : i32, i32
  }
  func.func @transform_1(%arg0: i32) -> (i32, i32) {
    %c0_i32 = arith.constant 0 : i32
    %c0_i32_0 = arith.constant 0 : i32
    return %arg0, %c0_i32 : i32, i32
  }
  func.func @transform_2(%arg0: i32) -> (i32, i32) {
    %c0_i32 = arith.constant 0 : i32
    %c0_i32_0 = arith.constant 0 : i32
    %c0_i32_1 = arith.constant 0 : i32
    return %c0_i32, %c0_i32_0 : i32, i32
  }
  func.func @transform_3(%arg0: i32) -> (i32, i32) {
    %c0_i32 = arith.constant 0 : i32
    %c0_i32_0 = arith.constant 0 : i32
    %c0_i32_1 = arith.constant 0 : i32
    return %c0_i32, %c0_i32_0 : i32, i32
  }
  func.func @transform_4(%arg0: i32) -> (i32, i32) {
    %c0_i32 = arith.constant 0 : i32
    %c0_i32_0 = arith.constant 0 : i32
    %c0_i32_1 = arith.constant 0 : i32
    return %c0_i32, %c0_i32_0 : i32, i32
  }
  func.func @transform_5(%arg0: i32) -> (i32, i32) {
    %c0_i32 = arith.constant 0 : i32
    %c0_i32_0 = arith.constant 0 : i32
    %c0_i32_1 = arith.constant 0 : i32
    return %c0_i32, %c0_i32_0 : i32, i32
  }
  func.func @transform_6(%arg0: i32) -> (i32, i32) {
    %c0_i32 = arith.constant 0 : i32
    %c0_i32_0 = arith.constant 0 : i32
    return %c0_i32, %arg0 : i32, i32
  }
}

</mosaic_0001>

<bundles_post_ra>
// kernel: xx_discriminator_dot.1
= control target key start
LH: loop header
LB: loop body
LE: loop exit
PB: predicated region body
PF: predicated region fallthrough
CT: control target
= control target key end

     0   :  { %11 = vsyncpa [#allocation3], 0  ;;  %s806_s0 = inlined_call_operand.hbm [shape: f32[8,512], index: 0, kind: input, shape index: {}]   ;;  %s807_s1 = inlined_call_operand.hbm [shape: f32[8,256], index: 1, kind: input, shape index: {}]   ;;  %s808_s2 = inlined_call_operand.hbm [shape: f32[512,256], index: 2, kind: input, shape index: {}]   ;;  %s809_s3 = inlined_call_operand.vmem [shape: f32[1,256], index: 3, kind: input, shape index: {}]   ;;  %s810_s4 = inlined_call_operand.hbm [shape: f32[256,256], index: 4, kind: input, shape index: {}]   ;;  %s811_s5 = inlined_call_operand.vmem [shape: f32[1,256], index: 5, kind: input, shape index: {}]   ;;  %s812_s6 = inlined_call_operand.hbm [shape: f32[1,8], index: 6, kind: output, shape index: {}]  }
   0x1   :  { %12 = vsyncpa [#allocation6], 0 }
   0x2   :  { %13 = vsyncpa [#allocation9], 0  ;;  %s31_s23 = sshll.u32 %s807_s1, 4  ;;  %s32_s23 = int_to_ptr.hbm [resolvable:$true] %s31_s23 }
   0x3   :  { %14 = vsyncpa [#allocation4], 0  ;;  %s727_s24 = smov [#allocation5]   ;;  %s20_s28 = sshll.u32 %s806_s0, 4  ;;  %s21_s28 = int_to_ptr.hbm [resolvable:$true] %s20_s28 }
   0x4   :  { %s33_s25 = sshll.u32 %s727_s24, 4  ;;  %s728_s29 = smov [#allocation2]   ;;  %s34_s25 = int_to_ptr.vmem [resolvable:$true] %s33_s25 }
   0x5   :  { %36 = dma.hbm_to_vmem [thread:$0]  %s32_s23, 256, %s34_s25, [#allocation6]  }
   0x6   :  { %s22_s30 = sshll.u32 %s728_s29, 4  ;;  %s41_s9 = sshll.u32 %s808_s2, 4  ;;  %s23_s30 = int_to_ptr.vmem [resolvable:$true] %s22_s30  ;;  %s42_s9 = int_to_ptr.hbm [resolvable:$true] %s41_s9 }
   0x7   :  { %25 = dma.hbm_to_vmem [thread:$0]  %s21_s28, 512, %s23_s30, [#allocation3]  }
   0x8   :  { %s729_s1 = smov [#allocation7]   ;;  %s56_s13 = sshll.u32 %s810_s4, 4  ;;  %s57_s13 = int_to_ptr.hbm [resolvable:$true] %s56_s13 }
   0x9   :  { %s43_s10 = sshll.u32 %s729_s1, 4  ;;  %s730_s14 = smov 256   ;;  %s44_s10 = int_to_ptr.vmem [resolvable:$true] %s43_s10 }
   0xa   :  { %s731_s0 = smov 16   ;;  %s732_s15 = smov [#allocation8]  }
   0xb   :  { %49 = dma.hbm_to_vmem [thread:$0]  %s42_s9, 16384, %s44_s10, [#allocation6], %s730_s14, %s730_s14, %s731_s0  }
   0xc   :  { %s58_s16 = sshll.u32 %s732_s15, 4  ;;  %s59_s16 = int_to_ptr.vmem [resolvable:$true] %s58_s16 }
   0xd   :  { %64 = dma.hbm_to_vmem [thread:$0]  %s57_s13, 8192, %s59_s16, [#allocation9], %s730_s14, %s730_s14, %s731_s0  }
   0xe   :  { %719 = dma.done.wait [#allocation3], 512  }
   0xf   :  { %720 = vsyncadd [#allocation3], 4294966784 }
  0x10   :  { %721 = dma.done.wait [#allocation6], 16640  }
  0x11   :  { %722 = vsyncadd [#allocation6], 4294950656 }
  0x12   :  { %723 = dma.done.wait [#allocation9], 8192  }
  0x13   :  { %724 = vsyncadd [#allocation9], 4294959104  ;;  %v119_v0 = vld [vmem:[#allocation7 + $0xf0] sm:$0xff]  ;;  %v117_v2 = vld [vmem:[#allocation7 + $0xe0] sm:$0xff]  ;;  %s579_s21 = sshll.u32 %s812_s6, 4  ;;  %vm570_vm0 = vcmask 57344   ;;  %s580_s21 = int_to_ptr.hbm [resolvable:$true] %s579_s21 }
  0x14   :  { %v183_v1 = vld [vmem:[#allocation7 + $0x2f0] sm:$0xff]  ;;  %223 = vmatpush.msra.mxu0 %v119_v0  ;;  %v181_v4 = vld [vmem:[#allocation7 + $0x2e0] sm:$0xff]  ;;  %v120_v62 = vld [vmem:[#allocation7 + $0xf8] sm:$0xff] }
  0x15   :  { %263 = vmatpush.msra.mxu2 %v183_v1  ;;  %v151_v3 = vld [vmem:[#allocation7 + $0x1f0] sm:$0xff]  ;;  %v149_v7 = vld [vmem:[#allocation7 + $0x1e0] sm:$0xff]  ;;  %v184_v63 = vld [vmem:[#allocation7 + $0x2f8] sm:$0xff] }
  0x16   :  { %v215_v5 = vld [vmem:[#allocation7 + $0x3f0] sm:$0xff]  ;;  %243 = vmatpush.msra.mxu1 %v151_v3  ;;  %224 = vmatpush.msra.mxu0 %v117_v2  ;;  %v213_v9 = vld [vmem:[#allocation7 + $0x3e0] sm:$0xff]  ;;  %v118_v2 = vld [vmem:[#allocation7 + $0xe8] sm:$0xff] }
  0x17   :  { %283 = vmatpush.msra.mxu3 %v215_v5  ;;  %v115_v6 = vld [vmem:[#allocation7 + $0xd0] sm:$0xff]  ;;  %264 = vmatpush.msra.mxu2 %v181_v4  ;;  %v113_v11 = vld [vmem:[#allocation7 + $0xc0] sm:$0xff]  ;;  %v152_v3 = vld [vmem:[#allocation7 + $0x1f8] sm:$0xff] }
  0x18   :  { %v179_v8 = vld [vmem:[#allocation7 + $0x2d0] sm:$0xff]  ;;  %244 = vmatpush.msra.mxu1 %v149_v7  ;;  %v177_v12 = vld [vmem:[#allocation7 + $0x2c0] sm:$0xff]  ;;  %225 = vmatpush.msra.mxu0 %v115_v6  ;;  %v182_v4 = vld [vmem:[#allocation7 + $0x2e8] sm:$0xff] }
  0x19   :  { %v147_v10 = vld [vmem:[#allocation7 + $0x1d0] sm:$0xff]  ;;  %284 = vmatpush.msra.mxu3 %v213_v9  ;;  %265 = vmatpush.msra.mxu2 %v179_v8  ;;  %v145_v14 = vld [vmem:[#allocation7 + $0x1c0] sm:$0xff]  ;;  %v216_v5 = vld [vmem:[#allocation7 + $0x3f8] sm:$0xff] }
  0x1a   :  { %v211_v13 = vld [vmem:[#allocation7 + $0x3d0] sm:$0xff]  ;;  %v209_v15 = vld [vmem:[#allocation7 + $0x3c0] sm:$0xff]  ;;  %245 = vmatpush.msra.mxu1 %v147_v10  ;;  %226 = vmatpush.msra.mxu0 %v113_v11  ;;  %v116_v6 = vld [vmem:[#allocation7 + $0xd8] sm:$0xff] }
  0x1b   :  { %285 = vmatpush.msra.mxu3 %v211_v13  ;;  %v111_v16 = vld [vmem:[#allocation7 + $0xb0] sm:$0xff]  ;;  %266 = vmatpush.msra.mxu2 %v177_v12  ;;  %v109_v20 = vld [vmem:[#allocation7 + $0xa0] sm:$0xff]  ;;  %v150_v7 = vld [vmem:[#allocation7 + $0x1e8] sm:$0xff] }
  0x1c   :  { %v175_v17 = vld [vmem:[#allocation7 + $0x2b0] sm:$0xff]  ;;  %246 = vmatpush.msra.mxu1 %v145_v14  ;;  %v173_v21 = vld [vmem:[#allocation7 + $0x2a0] sm:$0xff]  ;;  %227 = vmatpush.msra.mxu0 %v111_v16  ;;  %v180_v8 = vld [vmem:[#allocation7 + $0x2d8] sm:$0xff] }
  0x1d   :  { %v143_v18 = vld [vmem:[#allocation7 + $0x1b0] sm:$0xff]  ;;  %286 = vmatpush.msra.mxu3 %v209_v15  ;;  %267 = vmatpush.msra.mxu2 %v175_v17  ;;  %v141_v22 = vld [vmem:[#allocation7 + $0x1a0] sm:$0xff]  ;;  %v214_v9 = vld [vmem:[#allocation7 + $0x3e8] sm:$0xff] }
  0x1e   :  { %v207_v19 = vld [vmem:[#allocation7 + $0x3b0] sm:$0xff]  ;;  %v205_v23 = vld [vmem:[#allocation7 + $0x3a0] sm:$0xff]  ;;  %247 = vmatpush.msra.mxu1 %v143_v18  ;;  %228 = vmatpush.msra.mxu0 %v109_v20  ;;  %v114_v10 = vld [vmem:[#allocation7 + $0xc8] sm:$0xff] }
  0x1f   :  { %287 = vmatpush.msra.mxu3 %v207_v19  ;;  %v107_v24 = vld [vmem:[#allocation7 + $0x90] sm:$0xff]  ;;  %268 = vmatpush.msra.mxu2 %v173_v21  ;;  %v105_v28 = vld [vmem:[#allocation7 + $0x80] sm:$0xff]  ;;  %v148_v11 = vld [vmem:[#allocation7 + $0x1d8] sm:$0xff] }
  0x20   :  { %v171_v25 = vld [vmem:[#allocation7 + $0x290] sm:$0xff]  ;;  %248 = vmatpush.msra.mxu1 %v141_v22  ;;  %v169_v29 = vld [vmem:[#allocation7 + $0x280] sm:$0xff]  ;;  %229 = vmatpush.msra.mxu0 %v107_v24  ;;  %v178_v12 = vld [vmem:[#allocation7 + $0x2c8] sm:$0xff] }
  0x21   :  { %v139_v26 = vld [vmem:[#allocation7 + $0x190] sm:$0xff]  ;;  %288 = vmatpush.msra.mxu3 %v205_v23  ;;  %269 = vmatpush.msra.mxu2 %v171_v25  ;;  %v137_v30 = vld [vmem:[#allocation7 + $0x180] sm:$0xff]  ;;  %v212_v13 = vld [vmem:[#allocation7 + $0x3d8] sm:$0xff] }
  0x22   :  { %v203_v27 = vld [vmem:[#allocation7 + $0x390] sm:$0xff]  ;;  %v201_v31 = vld [vmem:[#allocation7 + $0x380] sm:$0xff]  ;;  %249 = vmatpush.msra.mxu1 %v139_v26  ;;  %230 = vmatpush.msra.mxu0 %v105_v28  ;;  %v112_v14 = vld [vmem:[#allocation7 + $0xb8] sm:$0xff] }
  0x23   :  { %289 = vmatpush.msra.mxu3 %v203_v27  ;;  %v103_v32 = vld [vmem:[#allocation7 + $0x70] sm:$0xff]  ;;  %270 = vmatpush.msra.mxu2 %v169_v29  ;;  %v101_v36 = vld [vmem:[#allocation7 + $0x60] sm:$0xff]  ;;  %v146_v15 = vld [vmem:[#allocation7 + $0x1c8] sm:$0xff] }
  0x24   :  { %v167_v33 = vld [vmem:[#allocation7 + $0x270] sm:$0xff]  ;;  %250 = vmatpush.msra.mxu1 %v137_v30  ;;  %v165_v37 = vld [vmem:[#allocation7 + $0x260] sm:$0xff]  ;;  %231 = vmatpush.msra.mxu0 %v103_v32  ;;  %v176_v16 = vld [vmem:[#allocation7 + $0x2b8] sm:$0xff] }
  0x25   :  { %v135_v34 = vld [vmem:[#allocation7 + $0x170] sm:$0xff]  ;;  %290 = vmatpush.msra.mxu3 %v201_v31  ;;  %271 = vmatpush.msra.mxu2 %v167_v33  ;;  %v133_v38 = vld [vmem:[#allocation7 + $0x160] sm:$0xff]  ;;  %v210_v17 = vld [vmem:[#allocation7 + $0x3c8] sm:$0xff] }
  0x26   :  { %v199_v35 = vld [vmem:[#allocation7 + $0x370] sm:$0xff]  ;;  %v197_v39 = vld [vmem:[#allocation7 + $0x360] sm:$0xff]  ;;  %251 = vmatpush.msra.mxu1 %v135_v34  ;;  %232 = vmatpush.msra.mxu0 %v101_v36  ;;  %v110_v18 = vld [vmem:[#allocation7 + $0xa8] sm:$0xff] }
  0x27   :  { %291 = vmatpush.msra.mxu3 %v199_v35  ;;  %v99_v40 = vld [vmem:[#allocation7 + $0x50] sm:$0xff]  ;;  %272 = vmatpush.msra.mxu2 %v165_v37  ;;  %v97_v44 = vld [vmem:[#allocation7 + $0x40] sm:$0xff]  ;;  %v144_v19 = vld [vmem:[#allocation7 + $0x1b8] sm:$0xff] }
  0x28   :  { %v163_v41 = vld [vmem:[#allocation7 + $0x250] sm:$0xff]  ;;  %252 = vmatpush.msra.mxu1 %v133_v38  ;;  %v161_v45 = vld [vmem:[#allocation7 + $0x240] sm:$0xff]  ;;  %233 = vmatpush.msra.mxu0 %v99_v40  ;;  %v174_v20 = vld [vmem:[#allocation7 + $0x2a8] sm:$0xff] }
  0x29   :  { %v131_v42 = vld [vmem:[#allocation7 + $0x150] sm:$0xff]  ;;  %292 = vmatpush.msra.mxu3 %v197_v39  ;;  %273 = vmatpush.msra.mxu2 %v163_v41  ;;  %v129_v46 = vld [vmem:[#allocation7 + $0x140] sm:$0xff]  ;;  %v208_v21 = vld [vmem:[#allocation7 + $0x3b8] sm:$0xff] }
  0x2a   :  { %v195_v43 = vld [vmem:[#allocation7 + $0x350] sm:$0xff]  ;;  %v193_v47 = vld [vmem:[#allocation7 + $0x340] sm:$0xff]  ;;  %253 = vmatpush.msra.mxu1 %v131_v42  ;;  %234 = vmatpush.msra.mxu0 %v97_v44  ;;  %v108_v22 = vld [vmem:[#allocation7 + $0x98] sm:$0xff] }
  0x2b   :  { %293 = vmatpush.msra.mxu3 %v195_v43  ;;  %v95_v48 = vld [vmem:[#allocation7 + $0x30] sm:$0xff]  ;;  %274 = vmatpush.msra.mxu2 %v161_v45  ;;  %v93_v52 = vld [vmem:[#allocation7 + $0x20] sm:$0xff]  ;;  %v142_v23 = vld [vmem:[#allocation7 + $0x1a8] sm:$0xff] }
  0x2c   :  { %v159_v49 = vld [vmem:[#allocation7 + $0x230] sm:$0xff]  ;;  %254 = vmatpush.msra.mxu1 %v129_v46  ;;  %v157_v53 = vld [vmem:[#allocation7 + $0x220] sm:$0xff]  ;;  %235 = vmatpush.msra.mxu0 %v95_v48  ;;  %v172_v24 = vld [vmem:[#allocation7 + $0x298] sm:$0xff] }
  0x2d   :  { %v127_v50 = vld [vmem:[#allocation7 + $0x130] sm:$0xff]  ;;  %294 = vmatpush.msra.mxu3 %v193_v47  ;;  %275 = vmatpush.msra.mxu2 %v159_v49  ;;  %v125_v54 = vld [vmem:[#allocation7 + $0x120] sm:$0xff]  ;;  %v206_v25 = vld [vmem:[#allocation7 + $0x3a8] sm:$0xff] }
  0x2e   :  { %v191_v51 = vld [vmem:[#allocation7 + $0x330] sm:$0xff]  ;;  %v189_v55 = vld [vmem:[#allocation7 + $0x320] sm:$0xff]  ;;  %255 = vmatpush.msra.mxu1 %v127_v50  ;;  %236 = vmatpush.msra.mxu0 %v93_v52  ;;  %v106_v26 = vld [vmem:[#allocation7 + $0x88] sm:$0xff] }
  0x2f   :  { %295 = vmatpush.msra.mxu3 %v191_v51  ;;  %v91_v56 = vld [vmem:[#allocation7 + $0x10] sm:$0xff]  ;;  %276 = vmatpush.msra.mxu2 %v157_v53  ;;  %v89_v60 = vld [vmem:[#allocation7] sm:$0xff]  ;;  %v140_v27 = vld [vmem:[#allocation7 + $0x198] sm:$0xff] }
  0x30   :  { %v155_v57 = vld [vmem:[#allocation7 + $0x210] sm:$0xff]  ;;  %256 = vmatpush.msra.mxu1 %v125_v54  ;;  %v153_v61 = vld [vmem:[#allocation7 + $0x200] sm:$0xff]  ;;  %237 = vmatpush.msra.mxu0 %v91_v56  ;;  %v170_v28 = vld [vmem:[#allocation7 + $0x288] sm:$0xff] }
  0x31   :  { %v123_v58 = vld [vmem:[#allocation7 + $0x110] sm:$0xff]  ;;  %296 = vmatpush.msra.mxu3 %v189_v55  ;;  %277 = vmatpush.msra.mxu2 %v155_v57  ;;  %v121_v0 = vld [vmem:[#allocation7 + $0x100] sm:$0xff]  ;;  %v204_v29 = vld [vmem:[#allocation7 + $0x398] sm:$0xff] }
  0x32   :  { %v187_v59 = vld [vmem:[#allocation7 + $0x310] sm:$0xff]  ;;  %257 = vmatpush.msra.mxu1 %v123_v58  ;;  %v185_v1 = vld [vmem:[#allocation7 + $0x300] sm:$0xff]  ;;  %238 = vmatpush.msra.mxu0 %v89_v60  ;;  %v104_v30 = vld [vmem:[#allocation7 + $0x78] sm:$0xff] }
  0x33   :  { %297 = vmatpush.msra.mxu3 %v187_v59  ;;  %278 = vmatpush.msra.mxu2 %v153_v61  ;;  %v138_v31 = vld [vmem:[#allocation7 + $0x188] sm:$0xff]  ;;  %v168_v32 = vld [vmem:[#allocation7 + $0x278] sm:$0xff] }
  0x34   :  { %303 = vmatpush.msrb.mxu0 %v120_v62  ;;  %258 = vmatpush.msra.mxu1 %v121_v0  ;;  %v202_v33 = vld [vmem:[#allocation7 + $0x388] sm:$0xff]  ;;  %v136_v35 = vld [vmem:[#allocation7 + $0x178] sm:$0xff]  ;;  %v781_v62 = vld [vmem:[#allocation2] sm:$0xff] }
  0x35   :  { %343 = vmatpush.msrb.mxu2 %v184_v63  ;;  %298 = vmatpush.msra.mxu3 %v185_v1  ;;  %v102_v34 = vld [vmem:[#allocation7 + $0x68] sm:$0xff]  ;;  %v200_v37 = vld [vmem:[#allocation7 + $0x378] sm:$0xff]  ;;  %v783_v63 = vld [vmem:[#allocation2 + $0x10] sm:$0xff] }
  0x36   :  { %304 = vmatpush.msrb.mxu0 %v118_v2  ;;  %323 = vmatpush.msrb.mxu1 %v152_v3  ;;  %v166_v36 = vld [vmem:[#allocation7 + $0x268] sm:$0xff]  ;;  %v100_v38 = vld [vmem:[#allocation7 + $0x58] sm:$0xff]  ;;  %v413_v0 = vld [vmem:[#allocation8 + $0xf0] sm:$0xff] }
  0x37   :  { %344 = vmatpush.msrb.mxu2 %v182_v4  ;;  %363 = vmatpush.msrb.mxu3 %v216_v5  ;;  %v134_v39 = vld [vmem:[#allocation7 + $0x168] sm:$0xff]  ;;  %v164_v40 = vld [vmem:[#allocation7 + $0x258] sm:$0xff] }
  0x38   :  { %305 = vmatpush.msrb.mxu0 %v116_v6  ;;  %324 = vmatpush.msrb.mxu1 %v150_v7  ;;  %v198_v41 = vld [vmem:[#allocation7 + $0x368] sm:$0xff]  ;;  %v132_v43 = vld [vmem:[#allocation7 + $0x158] sm:$0xff]  ;;  %v411_v6 = vld [vmem:[#allocation8 + $0xe0] sm:$0xff] }
  0x39   :  { %345 = vmatpush.msrb.mxu2 %v180_v8  ;;  %364 = vmatpush.msrb.mxu3 %v214_v9  ;;  %v98_v42 = vld [vmem:[#allocation7 + $0x48] sm:$0xff]  ;;  %v196_v45 = vld [vmem:[#allocation7 + $0x358] sm:$0xff]  ;;  %v445_v7 = vld [vmem:[#allocation8 + $0x1f0] sm:$0xff] }
  0x3a   :  { %306 = vmatpush.msrb.mxu0 %v114_v10  ;;  %325 = vmatpush.msrb.mxu1 %v148_v11  ;;  %v162_v44 = vld [vmem:[#allocation7 + $0x248] sm:$0xff]  ;;  %v96_v46 = vld [vmem:[#allocation7 + $0x38] sm:$0xff]  ;;  %v409_v10 = vld [vmem:[#allocation8 + $0xd0] sm:$0xff] }
  0x3b   :  { %346 = vmatpush.msrb.mxu2 %v178_v12  ;;  %365 = vmatpush.msrb.mxu3 %v212_v13  ;;  %v130_v47 = vld [vmem:[#allocation7 + $0x148] sm:$0xff]  ;;  %v160_v48 = vld [vmem:[#allocation7 + $0x238] sm:$0xff]  ;;  %v443_v11 = vld [vmem:[#allocation8 + $0x1e0] sm:$0xff] }
  0x3c   :  { %307 = vmatpush.msrb.mxu0 %v112_v14  ;;  %326 = vmatpush.msrb.mxu1 %v146_v15  ;;  %v194_v49 = vld [vmem:[#allocation7 + $0x348] sm:$0xff]  ;;  %v128_v51 = vld [vmem:[#allocation7 + $0x138] sm:$0xff]  ;;  %v407_v14 = vld [vmem:[#allocation8 + $0xc0] sm:$0xff] }
  0x3d   :  { %347 = vmatpush.msrb.mxu2 %v176_v16  ;;  %366 = vmatpush.msrb.mxu3 %v210_v17  ;;  %v94_v50 = vld [vmem:[#allocation7 + $0x28] sm:$0xff]  ;;  %v192_v53 = vld [vmem:[#allocation7 + $0x338] sm:$0xff]  ;;  %v441_v15 = vld [vmem:[#allocation8 + $0x1d0] sm:$0xff] }
  0x3e   :  { %308 = vmatpush.msrb.mxu0 %v110_v18  ;;  %327 = vmatpush.msrb.mxu1 %v144_v19  ;;  %v158_v52 = vld [vmem:[#allocation7 + $0x228] sm:$0xff]  ;;  %v92_v54 = vld [vmem:[#allocation7 + $0x18] sm:$0xff]  ;;  %v405_v18 = vld [vmem:[#allocation8 + $0xb0] sm:$0xff] }
  0x3f   :  { %348 = vmatpush.msrb.mxu2 %v174_v20  ;;  %367 = vmatpush.msrb.mxu3 %v208_v21  ;;  %v126_v55 = vld [vmem:[#allocation7 + $0x128] sm:$0xff]  ;;  %v156_v56 = vld [vmem:[#allocation7 + $0x218] sm:$0xff]  ;;  %v439_v19 = vld [vmem:[#allocation8 + $0x1c0] sm:$0xff] }
  0x40   :  { %309 = vmatpush.msrb.mxu0 %v108_v22  ;;  %328 = vmatpush.msrb.mxu1 %v142_v23  ;;  %v190_v57 = vld [vmem:[#allocation7 + $0x328] sm:$0xff]  ;;  %v124_v59 = vld [vmem:[#allocation7 + $0x118] sm:$0xff]  ;;  %v403_v22 = vld [vmem:[#allocation8 + $0xa0] sm:$0xff] }
  0x41   :  { %349 = vmatpush.msrb.mxu2 %v172_v24  ;;  %368 = vmatpush.msrb.mxu3 %v206_v25  ;;  %v90_v58 = vld [vmem:[#allocation7 + $0x8] sm:$0xff]  ;;  %v188_v61 = vld [vmem:[#allocation7 + $0x318] sm:$0xff]  ;;  %v437_v23 = vld [vmem:[#allocation8 + $0x1b0] sm:$0xff] }
  0x42   :  { %310 = vmatpush.msrb.mxu0 %v106_v26  ;;  %329 = vmatpush.msrb.mxu1 %v140_v27  ;;  %v154_v60 = vld [vmem:[#allocation7 + $0x208] sm:$0xff]  ;;  %v414_v1 = vld [vmem:[#allocation8 + $0xf8] sm:$0xff]  ;;  %v401_v26 = vld [vmem:[#allocation8 + $0x90] sm:$0xff] }
  0x43   :  { %350 = vmatpush.msrb.mxu2 %v170_v28  ;;  %369 = vmatpush.msrb.mxu3 %v204_v29  ;;  %v122_v2 = vld [vmem:[#allocation7 + $0x108] sm:$0xff]  ;;  %v787_v4 = vld [vmem:[#allocation2 + $0x8] sm:$0xff]  ;;  %v435_v27 = vld [vmem:[#allocation8 + $0x1a0] sm:$0xff] }
  0x44   :  { %311 = vmatpush.msrb.mxu0 %v104_v30  ;;  %330 = vmatpush.msrb.mxu1 %v138_v31  ;;  %v186_v3 = vld [vmem:[#allocation7 + $0x308] sm:$0xff]  ;;  %v446_v9 = vld [vmem:[#allocation8 + $0x1f8] sm:$0xff]  ;;  %v399_v30 = vld [vmem:[#allocation8 + $0x80] sm:$0xff] }
  0x45   :  { %351 = vmatpush.msrb.mxu2 %v168_v32  ;;  %370 = vmatpush.msrb.mxu3 %v202_v33  ;;  %v789_v5 = vld [vmem:[#allocation2 + $0x18] sm:$0xff]  ;;  %v410_v12 = vld [vmem:[#allocation8 + $0xd8] sm:$0xff]  ;;  %v433_v31 = vld [vmem:[#allocation8 + $0x190] sm:$0xff] }
  0x46   :  { %312 = vmatpush.msrb.mxu0 %v102_v34  ;;  %331 = vmatpush.msrb.mxu1 %v136_v35  ;;  %v412_v8 = vld [vmem:[#allocation8 + $0xe8] sm:$0xff]  ;;  %v442_v17 = vld [vmem:[#allocation8 + $0x1d8] sm:$0xff]  ;;  %v397_v34 = vld [vmem:[#allocation8 + $0x70] sm:$0xff] }
  0x47   :  { %352 = vmatpush.msrb.mxu2 %v166_v36  ;;  %371 = vmatpush.msrb.mxu3 %v200_v37  ;;  %v444_v13 = vld [vmem:[#allocation8 + $0x1e8] sm:$0xff]  ;;  %v406_v20 = vld [vmem:[#allocation8 + $0xb8] sm:$0xff]  ;;  %v431_v35 = vld [vmem:[#allocation8 + $0x180] sm:$0xff] }
  0x48   :  { %313 = vmatpush.msrb.mxu0 %v100_v38  ;;  %332 = vmatpush.msrb.mxu1 %v134_v39  ;;  %v408_v16 = vld [vmem:[#allocation8 + $0xc8] sm:$0xff]  ;;  %v438_v25 = vld [vmem:[#allocation8 + $0x1b8] sm:$0xff]  ;;  %v395_v38 = vld [vmem:[#allocation8 + $0x60] sm:$0xff] }
  0x49   :  { %353 = vmatpush.msrb.mxu2 %v164_v40  ;;  %372 = vmatpush.msrb.mxu3 %v198_v41  ;;  %v440_v21 = vld [vmem:[#allocation8 + $0x1c8] sm:$0xff]  ;;  %v402_v28 = vld [vmem:[#allocation8 + $0x98] sm:$0xff]  ;;  %v429_v39 = vld [vmem:[#allocation8 + $0x170] sm:$0xff] }
  0x4a   :  { %314 = vmatpush.msrb.mxu0 %v98_v42  ;;  %333 = vmatpush.msrb.mxu1 %v132_v43  ;;  %v404_v24 = vld [vmem:[#allocation8 + $0xa8] sm:$0xff]  ;;  %v434_v33 = vld [vmem:[#allocation8 + $0x198] sm:$0xff]  ;;  %v393_v42 = vld [vmem:[#allocation8 + $0x50] sm:$0xff] }
  0x4b   :  { %354 = vmatpush.msrb.mxu2 %v162_v44  ;;  %373 = vmatpush.msrb.mxu3 %v196_v45  ;;  %v436_v29 = vld [vmem:[#allocation8 + $0x1a8] sm:$0xff]  ;;  %v398_v36 = vld [vmem:[#allocation8 + $0x78] sm:$0xff]  ;;  %v427_v43 = vld [vmem:[#allocation8 + $0x160] sm:$0xff] }
  0x4c   :  { %315 = vmatpush.msrb.mxu0 %v96_v46  ;;  %334 = vmatpush.msrb.mxu1 %v130_v47  ;;  %v400_v32 = vld [vmem:[#allocation8 + $0x88] sm:$0xff]  ;;  %v430_v41 = vld [vmem:[#allocation8 + $0x178] sm:$0xff]  ;;  %v391_v46 = vld [vmem:[#allocation8 + $0x40] sm:$0xff] }
  0x4d   :  { %355 = vmatpush.msrb.mxu2 %v160_v48  ;;  %374 = vmatpush.msrb.mxu3 %v194_v49  ;;  %v432_v37 = vld [vmem:[#allocation8 + $0x188] sm:$0xff]  ;;  %v394_v44 = vld [vmem:[#allocation8 + $0x58] sm:$0xff]  ;;  %v425_v47 = vld [vmem:[#allocation8 + $0x150] sm:$0xff] }
  0x4e   :  { %316 = vmatpush.msrb.mxu0 %v94_v50  ;;  %335 = vmatpush.msrb.mxu1 %v128_v51  ;;  %v396_v40 = vld [vmem:[#allocation8 + $0x68] sm:$0xff]  ;;  %v426_v49 = vld [vmem:[#allocation8 + $0x158] sm:$0xff]  ;;  %v389_v50 = vld [vmem:[#allocation8 + $0x30] sm:$0xff] }
  0x4f   :  { %356 = vmatpush.msrb.mxu2 %v158_v52  ;;  %375 = vmatpush.msrb.mxu3 %v192_v53  ;;  %v428_v45 = vld [vmem:[#allocation8 + $0x168] sm:$0xff]  ;;  %v423_v51 = vld [vmem:[#allocation8 + $0x140] sm:$0xff]  ;;  %v390_v52 = vld [vmem:[#allocation8 + $0x38] sm:$0xff] }
  0x50   :  { %317 = vmatpush.msrb.mxu0 %v92_v54  ;;  %336 = vmatpush.msrb.mxu1 %v126_v55  ;;  %v392_v48 = vld [vmem:[#allocation8 + $0x48] sm:$0xff]  ;;  %v387_v54 = vld [vmem:[#allocation8 + $0x20] sm:$0xff]  ;;  %v421_v55 = vld [vmem:[#allocation8 + $0x130] sm:$0xff] }
  0x51   :  { %357 = vmatpush.msrb.mxu2 %v156_v56  ;;  %376 = vmatpush.msrb.mxu3 %v190_v57  ;;  %v424_v53 = vld [vmem:[#allocation8 + $0x148] sm:$0xff]  ;;  %v422_v57 = vld [vmem:[#allocation8 + $0x138] sm:$0xff] }
  0x52   :  { %318 = vmatpush.msrb.mxu0 %v90_v58  ;;  %337 = vmatpush.msrb.mxu1 %v124_v59  ;;  %v388_v56 = vld [vmem:[#allocation8 + $0x28] sm:$0xff]  ;;  %v385_v58 = vld [vmem:[#allocation8 + $0x10] sm:$0xff]  ;;  %v419_v59 = vld [vmem:[#allocation8 + $0x120] sm:$0xff] }
  0x53   :  { %358 = vmatpush.msrb.mxu2 %v154_v60  ;;  %377 = vmatpush.msrb.mxu3 %v188_v61  ;;  %v386_v60 = vld [vmem:[#allocation8 + $0x18] sm:$0xff]  ;;  %v420_v61 = vld [vmem:[#allocation8 + $0x128] sm:$0xff] }
  0x54   :  { %239 = vmatmul.f32.vlgmr.msra.gmra.mxu0 %v781_v62  ;;  %279 = vmatmul.f32.vlgmr.msra.gmra.mxu2 %v783_v63 }
  0x55   :  { %453 = vmatpush.msra.mxu0 %v413_v0  ;;  %493 = vmatpush.msra.mxu2 %v414_v1  ;;  %v384_v0 = vld [vmem:[#allocation8 + $0x8] sm:$0xff]  ;;  %v418_v1 = vld [vmem:[#allocation8 + $0x118] sm:$0xff] }
  0x56   :  { %338 = vmatpush.msrb.mxu1 %v122_v2  ;;  %378 = vmatpush.msrb.mxu3 %v186_v3  ;;  %v87_v2 = vld [vmem:[#allocation5] sm:$0xff]  ;;  %v415_v3 = vld [vmem:[#allocation8 + $0x100] sm:$0xff] }
  0x57   :  { %259 = vmatmul.f32.vlgmr.msra.gmra.mxu1 %v787_v4  ;;  %299 = vmatmul.f32.vlgmr.msra.gmra.mxu3 %v789_v5 }
  0x58   :  { %454 = vmatpush.msra.mxu0 %v411_v6  ;;  %473 = vmatpush.msra.mxu1 %v445_v7 }
  0x59   :  { %494 = vmatpush.msra.mxu2 %v412_v8  ;;  %513 = vmatpush.msra.mxu3 %v446_v9  ;;  %v217_v9 = vld [vmem:[%s809_s3] sm:$0x3]  ;;  %s733_s3 = smov [#allocation10]  }
  0x5a   :  { %455 = vmatpush.msra.mxu0 %v409_v10  ;;  %474 = vmatpush.msra.mxu1 %v443_v11 }
  0x5b   :  { %495 = vmatpush.msra.mxu2 %v410_v12  ;;  %514 = vmatpush.msra.mxu3 %v444_v13  ;;  %v219_v12 = vperm.slane %v217_v9, 0  ;;  %v220_v13 = vperm.slane %v217_v9, 1 }
  0x5c   :  { %456 = vmatpush.msra.mxu0 %v407_v14  ;;  %475 = vmatpush.msra.mxu1 %v441_v15 }
  0x5d   :  { %496 = vmatpush.msra.mxu2 %v408_v16  ;;  %515 = vmatpush.msra.mxu3 %v442_v17  ;;  %v447_v16 = vld [vmem:[%s811_s5] sm:$0x3]  ;;  %s577_s5 = sshll.u32 %s733_s3, 4  ;;  %s578_s5 = int_to_ptr.vmem [resolvable:$true] %s577_s5 }
  0x5e   :  { %457 = vmatpush.msra.mxu0 %v405_v18  ;;  %476 = vmatpush.msra.mxu1 %v439_v19 }
  0x5f   :  { %497 = vmatpush.msra.mxu2 %v406_v20  ;;  %516 = vmatpush.msra.mxu3 %v440_v21  ;;  %v449_v20 = vperm.slane %v447_v16, 0 }
  0x60   :  { %458 = vmatpush.msra.mxu0 %v403_v22  ;;  %477 = vmatpush.msra.mxu1 %v437_v23 }
  0x61   :  { %498 = vmatpush.msra.mxu2 %v404_v24  ;;  %517 = vmatpush.msra.mxu3 %v438_v25  ;;  %v450_v25 = vperm.slane %v447_v16, 1 }
  0x62   :  { %459 = vmatpush.msra.mxu0 %v401_v26  ;;  %478 = vmatpush.msra.mxu1 %v435_v27 }
  0x63   :  { %499 = vmatpush.msra.mxu2 %v402_v28  ;;  %518 = vmatpush.msra.mxu3 %v436_v29 }
  0x64   :  { %460 = vmatpush.msra.mxu0 %v399_v30  ;;  %479 = vmatpush.msra.mxu1 %v433_v31 }
  0x65   :  { %500 = vmatpush.msra.mxu2 %v400_v32  ;;  %519 = vmatpush.msra.mxu3 %v434_v33 }
  0x66   :  { %461 = vmatpush.msra.mxu0 %v397_v34  ;;  %480 = vmatpush.msra.mxu1 %v431_v35 }
  0x67   :  { %501 = vmatpush.msra.mxu2 %v398_v36  ;;  %520 = vmatpush.msra.mxu3 %v432_v37 }
  0x68   :  { %462 = vmatpush.msra.mxu0 %v395_v38  ;;  %481 = vmatpush.msra.mxu1 %v429_v39 }
  0x69   :  { %502 = vmatpush.msra.mxu2 %v396_v40  ;;  %521 = vmatpush.msra.mxu3 %v430_v41 }
  0x6a   :  { %463 = vmatpush.msra.mxu0 %v393_v42  ;;  %482 = vmatpush.msra.mxu1 %v427_v43 }
  0x6b   :  { %503 = vmatpush.msra.mxu2 %v394_v44  ;;  %522 = vmatpush.msra.mxu3 %v428_v45 }
  0x6c   :  { %464 = vmatpush.msra.mxu0 %v391_v46  ;;  %483 = vmatpush.msra.mxu1 %v425_v47 }
  0x6d   :  { %504 = vmatpush.msra.mxu2 %v392_v48  ;;  %523 = vmatpush.msra.mxu3 %v426_v49 }
  0x6e   :  { %319 = vmatmul.f32.vlgmr.msrb.gmra.mxu0 %v781_v62  ;;  %359 = vmatmul.f32.vlgmr.msrb.gmra.mxu2 %v783_v63  ;;  %v383_v62 = vld [vmem:[#allocation8] sm:$0xff]  ;;  %v417_v63 = vld [vmem:[#allocation8 + $0x110] sm:$0xff] }
  0x6f   :  { %465 = vmatpush.msra.mxu0 %v389_v50  ;;  %484 = vmatpush.msra.mxu1 %v423_v51 }
  0x70   :  { %505 = vmatpush.msra.mxu2 %v390_v52  ;;  %524 = vmatpush.msra.mxu3 %v424_v53 }
  0x71   :  { %339 = vmatmul.f32.vlgmr.msrb.gmra.mxu1 %v787_v4  ;;  %379 = vmatmul.f32.vlgmr.msrb.gmra.mxu3 %v789_v5  ;;  %v416_v4 = vld [vmem:[#allocation8 + $0x108] sm:$0xff]  ;;  %v88_v5 = vld [vmem:[#allocation5 + $0x8] sm:$0xff] }
  0x72   :  { %466 = vmatpush.msra.mxu0 %v387_v54  ;;  %485 = vmatpush.msra.mxu1 %v421_v55 }
  0x73   :  { %506 = vmatpush.msra.mxu2 %v388_v56  ;;  %525 = vmatpush.msra.mxu3 %v422_v57 }
  0x74   :  { %467 = vmatpush.msra.mxu0 %v385_v58  ;;  %486 = vmatpush.msra.mxu1 %v419_v59 }
  0x75   :  { %507 = vmatpush.msra.mxu2 %v386_v60  ;;  %526 = vmatpush.msra.mxu3 %v420_v61 }
  0x76   :  { %468 = vmatpush.msra.mxu0 %v383_v62  ;;  %487 = vmatpush.msra.mxu1 %v417_v63 }
  0x77   :  { %508 = vmatpush.msra.mxu2 %v384_v0  ;;  %527 = vmatpush.msra.mxu3 %v418_v1 }
  0x78   :  { %469 = vmatmul.f32.vlgmr.msra.gmra.mxu0 %v87_v2  ;;  %509 = vmatmul.f32.vlgmr.msra.gmra.mxu2 %v87_v2 }
  0x79   :  { %488 = vmatpush.msra.mxu1 %v415_v3  ;;  %528 = vmatpush.msra.mxu3 %v416_v4 }
  0x7a   :  { %489 = vmatmul.f32.vlgmr.msra.gmra.mxu1 %v88_v5  ;;  %529 = vmatmul.f32.vlgmr.msra.gmra.mxu3 %v88_v5 }
  0xd1   :  { %v240_v6 = vpop.f32.mrf.mxu0 }
  0xd2   :  { %v241_v17 = vadd.f32 %v240_v6, %v219_v12 }
  0xd4   :  { %v260_v7 = vpop.f32.mrf.mxu1 }
  0xd5   :  { %v261_v22 = vadd.f32 %v260_v7, %v241_v17 }
  0xd7   :  { %v280_v8 = vpop.f32.mrf.mxu2 }
  0xd8   :  { %v281_v27 = vadd.f32 %v280_v8, %v261_v22 }
  0xda   :  { %v300_v11 = vpop.f32.mrf.mxu3 }
  0xdb   :  { %v301_v33 = vadd.f32 %v300_v11, %v281_v27 }
  0xeb   :  { %v320_v10 = vpop.f32.mrf.mxu0 }
  0xec   :  { %v321_v18 = vadd.f32 %v320_v10, %v220_v13 }
  0xee   :  { %v340_v14 = vpop.f32.mrf.mxu1 }
  0xef   :  { %v341_v23 = vadd.f32 %v340_v14, %v321_v18 }
  0xf1   :  { %v360_v15 = vpop.f32.mrf.mxu2 }
  0xf2   :  { %v361_v28 = vadd.f32 %v360_v15, %v341_v23 }
  0xf4   :  { %v380_v19 = vpop.f32.mrf.mxu3 }
  0xf5   :  { %v470_v21 = vpop.f32.mrf.mxu0  ;;  %v381_v34 = vadd.f32 %v380_v19, %v361_v28 }
  0xf6   :  { %v471_v24 = vadd.f32 %v470_v21, %v449_v20 }
  0xf7   :  { %v490_v26 = vpop.f32.mrf.mxu1 }
  0xf8   :  { %v491_v30 = vadd.f32 %v490_v26, %v471_v24 }
  0xfa   :  { %v533_v36 = vmul.f32 %v491_v30, %v301_v33 }
  0xfb   :  { %v510_v29 = vpop.f32.mrf.mxu2 }
  0xfc   :  { %v511_v31 = vadd.f32 %v510_v29, %v450_v25 }
  0xfd   :  { %v530_v32 = vpop.f32.mrf.mxu3 }
  0xfe   :  { %v531_v35 = vadd.f32 %v530_v32, %v511_v31 }
 0x100   :  { %v534_v37 = vmul.f32 %v531_v35, %v381_v34 }
 0x102   :  { %v535_v38 = vadd.f32 %v534_v37, %v533_v36 }
 0x104   :  { %536 = vadd.xlane.f32.xlu0 %v535_v38 }
 0x177   :  { %v537_v39 = vpop.xlane.xlu0 %536 }
 0x178   :  { %538 = vxpose.xlu0.b32.start.end [1/1] (short) (narrow) %v537_v39, 8 }
 0x21c   :  { %v554_v40 = vpop.trf.xlu0 }
 0x21d   :  { %571 = vst.msk [vmem:[#allocation10] sm:$0x1] %vm570_vm0, %v554_v40 }
 0x21e   :  { %582 = dma.vmem_to_hbm [thread:$0]  %s578_s5, 16, %s580_s21, [#allocation4]  }
 0x21f   :  { %725 = dma.done.wait [#allocation4], 16  }
 0x220   :  { %726 = vsyncadd [#allocation4], 4294967280 }
 0x221   :  { %587 = vsyncpa [#allocation3], 1 }
 0x222   :  { %588 = vsyncpa [#allocation6], 1 }
 0x223   :  { %589 = vsyncpa [#allocation9], 1 }
 0x224   :  { %590 = vsyncpa [#allocation4], 1 }

</bundles_post_ra>
